<compile_context>
chip_gen: v7x
topology: tpu7x:2x2x1
jax: 0.10.0
libtpu: 0.0.40
codegen_flags: <defaults>
</compile_context>

<pallas_src>
import functools

import jax
import jax.numpy as jnp
from jax import lax
from jax.experimental import pallas as pl
from jax.experimental.pallas import tpu as pltpu


def _bilinear_rows(coords_col, src_size):
    """(dst, src) matrix M, M[i, h] = bilinear weight of source row h for
    output row i.  coords_col: (dst, 1) fractional source pixel coords.
    Out-of-range neighbours get weight 0 (== grid_sample zeros padding)."""
    dst = coords_col.shape[0]
    h = lax.broadcasted_iota(jnp.int32, (dst, src_size), 1).astype(jnp.float32)
    c0 = jnp.floor(coords_col)
    w1 = coords_col - c0
    w0 = 1.0 - w1
    return jnp.where(h == c0, w0, 0.0) + jnp.where(h == c0 + 1.0, w1, 0.0)


def _bilinear_cols_T(coords_row, src_size):
    """(src, dst) matrix M, M[w, j] = bilinear weight of source column w for
    output column j.  coords_row: (1, dst) fractional source pixel coords."""
    dst = coords_row.shape[1]
    w = lax.broadcasted_iota(jnp.int32, (src_size, dst), 0).astype(jnp.float32)
    c0 = jnp.floor(coords_row)
    w1 = coords_row - c0
    w0 = 1.0 - w1
    return jnp.where(w == c0, w0, 0.0) + jnp.where(w == c0 + 1.0, w1, 0.0)


def _st_kernel(z_ref, x_ref, o_ref, *, Hin, Win, Hout, Wout, C,
               inverse, align_corners):
    b = pl.program_id(0)

    # ---- z_where -> theta params (scalar path, SMEM) ------------------------
    sx = z_ref[b, 0]
    sy = z_ref[b, 1]
    tx = z_ref[b, 2]
    ty = z_ref[b, 3]
    if inverse:                       # SpatialTransformer.inverse_z_where
        tx = -tx / (sx + 1e-6)
        ty = -ty / (sy + 1e-6)
        sx = 1.0 / (sx + 1e-6)
        sy = 1.0 / (sy + 1e-6)

    # ---- affine_grid: output pixel -> normalized -> source pixel coords -----
    jj = lax.broadcasted_iota(jnp.int32, (1, Wout), 1).astype(jnp.float32)
    ii = lax.broadcasted_iota(jnp.int32, (Hout, 1), 0).astype(jnp.float32)
    if align_corners:
        xn = 2.0 * jj / max(Wout - 1, 1) - 1.0
        yn = 2.0 * ii / max(Hout - 1, 1) - 1.0
    else:
        xn = (2.0 * jj + 1.0) / Wout - 1.0
        yn = (2.0 * ii + 1.0) / Hout - 1.0
    gx = sx * xn + tx                 # (1, Wout)  normalized source x
    gy = sy * yn + ty                 # (Hout, 1)  normalized source y
    if align_corners:
        ix = (gx + 1.0) * (Win - 1) * 0.5
        iy = (gy + 1.0) * (Hin - 1) * 0.5
    else:
        ix = ((gx + 1.0) * Win - 1.0) * 0.5
        iy = ((gy + 1.0) * Hin - 1.0) * 0.5

    # ---- separable bilinear grid_sample as two MXU matmuls -------------------
    wy = _bilinear_rows(iy, Hin)      # (Hout, Hin)
    wxT = _bilinear_cols_T(ix, Win)   # (Win, Wout)
    for c in range(C):                # C is tiny (1 for SQAIR); static unroll
        img = x_ref[0, c].astype(jnp.float32)                          # (Hin, Win)
        tmp = jnp.dot(img, wxT, precision=lax.Precision.HIGHEST,
                      preferred_element_type=jnp.float32)              # (Hin, Wout)
        out = jnp.dot(wy, tmp, precision=lax.Precision.HIGHEST,
                      preferred_element_type=jnp.float32)              # (Hout, Wout)
        o_ref[0, c] = out.astype(o_ref.dtype)


def spatial_transformer(x, z_where, output_size, *, inverse=False,
                        align_corners=False):
    """Pallas forward of SpatialTransformer.forward.

    Args:
        x:           (B, C, Hin, Win) image / glimpse batch.
        z_where:     (B, 4) = (sx, sy, x, y).
        output_size: (Hout, Wout).
    Returns:
        (B, C, Hout, Wout)
    """
    B, C, Hin, Win = x.shape
    Hout, Wout = output_size
    kernel = functools.partial(_st_kernel, Hin=Hin, Win=Win, Hout=Hout,
                               Wout=Wout, C=C, inverse=inverse,
                               align_corners=align_corners)
    return pl.pallas_call(
        kernel,
        out_shape=jax.ShapeDtypeStruct((B, C, Hout, Wout), x.dtype),
        grid=(B,),
        in_specs=[
            pl.BlockSpec(memory_space=pltpu.MemorySpace.SMEM),        # z_where
            pl.BlockSpec((1, C, Hin, Win), lambda b: (b, 0, 0, 0)),   # image tile
        ],
        out_specs=pl.BlockSpec((1, C, Hout, Wout), lambda b: (b, 0, 0, 0)),
        compiler_params=pltpu.CompilerParams(
            dimension_semantics=("parallel",)),
    )(z_where.astype(jnp.float32), x)


def _reference(x, z_where, output_size, inverse=False, align_corners=False):
    """Pure-jnp gather-based affine_grid + grid_sample (bilinear, zeros
    padding) for axis-aligned theta — independent check of the kernel."""
    x = x.astype(jnp.float32)
    B, C, Hin, Win = x.shape
    Hout, Wout = output_size
    s = z_where[:, 0:2].astype(jnp.float32)
    t = z_where[:, 2:4].astype(jnp.float32)
    if inverse:
        t = -t / (s + 1e-6)
        s = 1.0 / (s + 1e-6)
    jj = jnp.arange(Wout, dtype=jnp.float32)
    ii = jnp.arange(Hout, dtype=jnp.float32)
    if align_corners:
        xn = 2.0 * jj / max(Wout - 1, 1) - 1.0
        yn = 2.0 * ii / max(Hout - 1, 1) - 1.0
    else:
        xn = (2.0 * jj + 1.0) / Wout - 1.0
        yn = (2.0 * ii + 1.0) / Hout - 1.0
    gx = s[:, 0:1] * xn[None, :] + t[:, 0:1]        # (B, Wout)
    gy = s[:, 1:2] * yn[None, :] + t[:, 1:2]        # (B, Hout)
    if align_corners:
        ix = (gx + 1.0) * (Win - 1) * 0.5
        iy = (gy + 1.0) * (Hin - 1) * 0.5
    else:
        ix = ((gx + 1.0) * Win - 1.0) * 0.5
        iy = ((gy + 1.0) * Hin - 1.0) * 0.5
    ix0 = jnp.floor(ix)
    iy0 = jnp.floor(iy)
    wx1 = ix - ix0
    wy1 = iy - iy0
    bi = jnp.arange(B)[:, None, None, None]
    ci = jnp.arange(C)[None, :, None, None]
    out = jnp.zeros((B, C, Hout, Wout), jnp.float32)
    for dy, wy in ((0, 1.0 - wy1), (1, wy1)):
        for dx, wx in ((0, 1.0 - wx1), (1, wx1)):
            yi = (iy0 + dy).astype(jnp.int32)        # (B, Hout)
            xi = (ix0 + dx).astype(jnp.int32)        # (B, Wout)
            vy = ((yi >= 0) & (yi < Hin)).astype(jnp.float32)
            vx = ((xi >= 0) & (xi < Win)).astype(jnp.float32)
            yi_c = jnp.clip(yi, 0, Hin - 1)
            xi_c = jnp.clip(xi, 0, Win - 1)
            vals = x[bi, ci, yi_c[:, None, :, None], xi_c[:, None, None, :]]
            w = (wy * vy)[:, None, :, None] * (wx * vx)[:, None, None, :]
            out = out + vals * w
    return out


if __name__ == "__main__":
    key = jax.random.PRNGKey(0)
    kx1, kx2, ks, kt = jax.random.split(key, 4)

    B, C = 2, 1
    GLIMPSE = (16, 16)
    IMAGE = (32, 32)

    # z_where = (sx, sy, x, y); scales > 1 per the glimpse-to-image convention.
    scales = 1.0 + 2.0 * jax.random.uniform(ks, (B, 2), jnp.float32)
    trans = jax.random.uniform(kt, (B, 2), jnp.float32, -0.5, 0.5)
    z_where = jnp.concatenate([scales, trans], axis=-1)

    # glimpse -> image (inverse=False)
    glimpse = jax.random.normal(kx1, (B, C) + GLIMPSE, jnp.float32)
    img_out = spatial_transformer(glimpse, z_where, IMAGE, inverse=False)

    # image -> glimpse (inverse=True)
    image = jax.random.normal(kx2, (B, C) + IMAGE, jnp.float32)
    gl_out = spatial_transformer(image, z_where, GLIMPSE, inverse=True)

    jax.block_until_ready((img_out, gl_out))

    ref_img = _reference(glimpse, z_where, IMAGE, inverse=False)
    ref_gl = _reference(image, z_where, GLIMPSE, inverse=True)

    assert img_out.shape == (B, C) + IMAGE
    assert gl_out.shape == (B, C) + GLIMPSE
    assert jnp.allclose(img_out, ref_img, atol=1e-4, rtol=1e-4), \
        float(jnp.max(jnp.abs(img_out - ref_img)))
    assert jnp.allclose(gl_out, ref_gl, atol=1e-4, rtol=1e-4), \
        float(jnp.max(jnp.abs(gl_out - ref_gl)))

    print("KERNEL_OK")
</pallas_src>

<mosaic_0001>
module attributes {stable_mosaic.version = 11 : i64} {
  func.func @_st_kernel(%arg0: i32, %arg1: memref<2x4xf32, #tpu.memory_space<smem>>, %arg2: memref<1x1x16x16xf32, #tpu.memory_space<vmem>>, %arg3: memref<1x1x32x32xf32, #tpu.memory_space<vmem>>) attributes {dimension_semantics = [#tpu.dimension_semantics<parallel>], iteration_bounds = array<i64: 2>, scalar_prefetch = 0 : i64, scratch_operands = 0 : i64, tpu.core_type = #tpu.core_type<tc>, window_params = [{transform_indices = @transform_0, window_bounds = array<i64: 2, 4>}, {transform_indices = @transform_1, window_bounds = array<i64: 1, 1, 16, 16>}, {transform_indices = @transform_2, window_bounds = array<i64: 1, 1, 32, 32>}]} {
    %0 = arith.index_cast %arg0 : i32 to index
    %c0 = arith.constant 0 : index
    %1 = memref.load %arg1[%0, %c0] : memref<2x4xf32, #tpu.memory_space<smem>>
    %2 = arith.index_cast %arg0 : i32 to index
    %c1 = arith.constant 1 : index
    %3 = memref.load %arg1[%2, %c1] : memref<2x4xf32, #tpu.memory_space<smem>>
    %4 = arith.index_cast %arg0 : i32 to index
    %c2 = arith.constant 2 : index
    %5 = memref.load %arg1[%4, %c2] : memref<2x4xf32, #tpu.memory_space<smem>>
    %6 = arith.index_cast %arg0 : i32 to index
    %c3 = arith.constant 3 : index
    %7 = memref.load %arg1[%6, %c3] : memref<2x4xf32, #tpu.memory_space<smem>>
    %8 = tpu.iota {dimensions = array<i32: 1>} : vector<1x32xi32>
    %9 = arith.sitofp %8 : vector<1x32xi32> to vector<1x32xf32>
    %10 = tpu.iota {dimensions = array<i32: 0>} : vector<32x1xi32>
    %11 = arith.sitofp %10 : vector<32x1xi32> to vector<32x1xf32>
    %cst = arith.constant 2.000000e+00 : f32
    %12 = vector.broadcast %cst : f32 to vector<1x32xf32>
    %13 = arith.mulf %12, %9 : vector<1x32xf32>
    %cst_0 = arith.constant 1.000000e+00 : f32
    %14 = vector.broadcast %cst_0 : f32 to vector<1x32xf32>
    %15 = arith.addf %13, %14 : vector<1x32xf32>
    %cst_1 = arith.constant 3.200000e+01 : f32
    %16 = vector.broadcast %cst_1 : f32 to vector<1x32xf32>
    %17 = arith.divf %15, %16 : vector<1x32xf32>
    %cst_2 = arith.constant 1.000000e+00 : f32
    %18 = vector.broadcast %cst_2 : f32 to vector<1x32xf32>
    %19 = arith.subf %17, %18 : vector<1x32xf32>
    %cst_3 = arith.constant 2.000000e+00 : f32
    %20 = vector.broadcast %cst_3 : f32 to vector<32x1xf32>
    %21 = arith.mulf %20, %11 : vector<32x1xf32>
    %cst_4 = arith.constant 1.000000e+00 : f32
    %22 = vector.broadcast %cst_4 : f32 to vector<32x1xf32>
    %23 = arith.addf %21, %22 : vector<32x1xf32>
    %cst_5 = arith.constant 3.200000e+01 : f32
    %24 = vector.broadcast %cst_5 : f32 to vector<32x1xf32>
    %25 = arith.divf %23, %24 : vector<32x1xf32>
    %cst_6 = arith.constant 1.000000e+00 : f32
    %26 = vector.broadcast %cst_6 : f32 to vector<32x1xf32>
    %27 = arith.subf %25, %26 : vector<32x1xf32>
    %28 = vector.broadcast %1 : f32 to vector<1x32xf32>
    %29 = arith.mulf %28, %19 : vector<1x32xf32>
    %30 = vector.broadcast %5 : f32 to vector<1x32xf32>
    %31 = arith.addf %29, %30 : vector<1x32xf32>
    %32 = vector.broadcast %3 : f32 to vector<32x1xf32>
    %33 = arith.mulf %32, %27 : vector<32x1xf32>
    %34 = vector.broadcast %7 : f32 to vector<32x1xf32>
    %35 = arith.addf %33, %34 : vector<32x1xf32>
    %cst_7 = arith.constant 1.000000e+00 : f32
    %36 = vector.broadcast %cst_7 : f32 to vector<1x32xf32>
    %37 = arith.addf %31, %36 : vector<1x32xf32>
    %cst_8 = arith.constant 1.600000e+01 : f32
    %38 = vector.broadcast %cst_8 : f32 to vector<1x32xf32>
    %39 = arith.mulf %37, %38 : vector<1x32xf32>
    %cst_9 = arith.constant 1.000000e+00 : f32
    %40 = vector.broadcast %cst_9 : f32 to vector<1x32xf32>
    %41 = arith.subf %39, %40 : vector<1x32xf32>
    %cst_10 = arith.constant 5.000000e-01 : f32
    %42 = vector.broadcast %cst_10 : f32 to vector<1x32xf32>
    %43 = arith.mulf %41, %42 : vector<1x32xf32>
    %cst_11 = arith.constant 1.000000e+00 : f32
    %44 = vector.broadcast %cst_11 : f32 to vector<32x1xf32>
    %45 = arith.addf %35, %44 : vector<32x1xf32>
    %cst_12 = arith.constant 1.600000e+01 : f32
    %46 = vector.broadcast %cst_12 : f32 to vector<32x1xf32>
    %47 = arith.mulf %45, %46 : vector<32x1xf32>
    %cst_13 = arith.constant 1.000000e+00 : f32
    %48 = vector.broadcast %cst_13 : f32 to vector<32x1xf32>
    %49 = arith.subf %47, %48 : vector<32x1xf32>
    %cst_14 = arith.constant 5.000000e-01 : f32
    %50 = vector.broadcast %cst_14 : f32 to vector<32x1xf32>
    %51 = arith.mulf %49, %50 : vector<32x1xf32>
    %52 = tpu.iota {dimensions = array<i32: 1>} : vector<32x16xi32>
    %53 = arith.sitofp %52 : vector<32x16xi32> to vector<32x16xf32>
    %54 = math.floor %51 : vector<32x1xf32>
    %55 = arith.subf %51, %54 : vector<32x1xf32>
    %cst_15 = arith.constant 1.000000e+00 : f32
    %56 = vector.broadcast %cst_15 : f32 to vector<32x1xf32>
    %57 = arith.subf %56, %55 : vector<32x1xf32>
    %58 = vector.broadcast %54 : vector<32x1xf32> to vector<32x16xf32>
    %59 = arith.cmpf oeq, %53, %58 : vector<32x16xf32>
    %cst_16 = arith.constant 0.000000e+00 : f32
    %60 = vector.shape_cast %57 : vector<32x1xf32> to vector<32x1xf32>
    %61 = vector.broadcast %60 : vector<32x1xf32> to vector<32x16xf32>
    %62 = vector.broadcast %cst_16 : f32 to vector<32x16xf32>
    %63 = arith.select %59, %61, %62 : vector<32x16xi1>, vector<32x16xf32>
    %cst_17 = arith.constant 1.000000e+00 : f32
    %64 = vector.broadcast %cst_17 : f32 to vector<32x1xf32>
    %65 = arith.addf %54, %64 : vector<32x1xf32>
    %66 = vector.broadcast %65 : vector<32x1xf32> to vector<32x16xf32>
    %67 = arith.cmpf oeq, %53, %66 : vector<32x16xf32>
    %cst_18 = arith.constant 0.000000e+00 : f32
    %68 = vector.shape_cast %55 : vector<32x1xf32> to vector<32x1xf32>
    %69 = vector.broadcast %68 : vector<32x1xf32> to vector<32x16xf32>
    %70 = vector.broadcast %cst_18 : f32 to vector<32x16xf32>
    %71 = arith.select %67, %69, %70 : vector<32x16xi1>, vector<32x16xf32>
    %72 = arith.addf %63, %71 : vector<32x16xf32>
    %73 = tpu.iota {dimensions = array<i32: 0>} : vector<16x32xi32>
    %74 = arith.sitofp %73 : vector<16x32xi32> to vector<16x32xf32>
    %75 = math.floor %43 : vector<1x32xf32>
    %76 = arith.subf %43, %75 : vector<1x32xf32>
    %cst_19 = arith.constant 1.000000e+00 : f32
    %77 = vector.broadcast %cst_19 : f32 to vector<1x32xf32>
    %78 = arith.subf %77, %76 : vector<1x32xf32>
    %79 = vector.broadcast %75 : vector<1x32xf32> to vector<16x32xf32>
    %80 = arith.cmpf oeq, %74, %79 : vector<16x32xf32>
    %cst_20 = arith.constant 0.000000e+00 : f32
    %81 = vector.shape_cast %78 : vector<1x32xf32> to vector<1x32xf32>
    %82 = vector.broadcast %81 : vector<1x32xf32> to vector<16x32xf32>
    %83 = vector.broadcast %cst_20 : f32 to vector<16x32xf32>
    %84 = arith.select %80, %82, %83 : vector<16x32xi1>, vector<16x32xf32>
    %cst_21 = arith.constant 1.000000e+00 : f32
    %85 = vector.broadcast %cst_21 : f32 to vector<1x32xf32>
    %86 = arith.addf %75, %85 : vector<1x32xf32>
    %87 = vector.broadcast %86 : vector<1x32xf32> to vector<16x32xf32>
    %88 = arith.cmpf oeq, %74, %87 : vector<16x32xf32>
    %cst_22 = arith.constant 0.000000e+00 : f32
    %89 = vector.shape_cast %76 : vector<1x32xf32> to vector<1x32xf32>
    %90 = vector.broadcast %89 : vector<1x32xf32> to vector<16x32xf32>
    %91 = vector.broadcast %cst_22 : f32 to vector<16x32xf32>
    %92 = arith.select %88, %90, %91 : vector<16x32xi1>, vector<16x32xf32>
    %93 = arith.addf %84, %92 : vector<16x32xf32>
    %c0_23 = arith.constant 0 : index
    %c0_24 = arith.constant 0 : index
    %c0_25 = arith.constant 0 : index
    %c0_26 = arith.constant 0 : index
    %94 = vector.load %arg2[%c0_23, %c0_24, %c0_25, %c0_26] : memref<1x1x16x16xf32, #tpu.memory_space<vmem>>, vector<1x1x16x16xf32>
    %95 = vector.shape_cast %94 : vector<1x1x16x16xf32> to vector<16x16xf32>
    %cst_27 = arith.constant dense<0.000000e+00> : vector<16x32xf32>
    %96 = tpu.matmul %95, %93, %cst_27 {dimension_numbers = #tpu.dot_dimension_numbers<[1], [0], [0], [1], [0, 0, 1, 1], [], []>, precision = #tpu.contract_precision<fp32>} : vector<16x16xf32>, vector<16x32xf32>, vector<16x32xf32> -> vector<16x32xf32>
    %cst_28 = arith.constant dense<0.000000e+00> : vector<32x32xf32>
    %97 = tpu.matmul %72, %96, %cst_28 {dimension_numbers = #tpu.dot_dimension_numbers<[1], [0], [0], [1], [0, 0, 1, 1], [], []>, precision = #tpu.contract_precision<fp32>} : vector<32x16xf32>, vector<16x32xf32>, vector<32x32xf32> -> vector<32x32xf32>
    %c0_29 = arith.constant 0 : index
    %c0_30 = arith.constant 0 : index
    %c0_31 = arith.constant 0 : index
    %c0_32 = arith.constant 0 : index
    %98 = vector.load %arg3[%c0_29, %c0_30, %c0_31, %c0_32] : memref<1x1x32x32xf32, #tpu.memory_space<vmem>>, vector<1x1x32x32xf32>
    %99 = vector.shape_cast %98 : vector<1x1x32x32xf32> to vector<32x32xf32>
    %100 = vector.shape_cast %97 : vector<32x32xf32> to vector<1x1x32x32xf32>
    tpu.vector_store %arg3[%c0_29, %c0_30, %c0_31, %c0_32], %100 {strides = array<i32>} : memref<1x1x32x32xf32, #tpu.memory_space<vmem>>, vector<1x1x32x32xf32>,
    return
  }
  func.func @transform_0(%arg0: i32) -> (i32, i32) {
    %c0_i32 = arith.constant 0 : i32
    %c0_i32_0 = arith.constant 0 : i32
    %c0_i32_1 = arith.constant 0 : i32
    return %c0_i32, %c0_i32_0 : i32, i32
  }
  func.func @transform_1(%arg0: i32) -> (i32, i32, i32, i32) {
    %c0_i32 = arith.constant 0 : i32
    %c0_i32_0 = arith.constant 0 : i32
    %c0_i32_1 = arith.constant 0 : i32
    %c0_i32_2 = arith.constant 0 : i32
    return %arg0, %c0_i32, %c0_i32_0, %c0_i32_1 : i32, i32, i32, i32
  }
  func.func @transform_2(%arg0: i32) -> (i32, i32, i32, i32) {
    %c0_i32 = arith.constant 0 : i32
    %c0_i32_0 = arith.constant 0 : i32
    %c0_i32_1 = arith.constant 0 : i32
    %c0_i32_2 = arith.constant 0 : i32
    return %arg0, %c0_i32, %c0_i32_0, %c0_i32_1 : i32, i32, i32, i32
  }
}

</mosaic_0001>

<bundles_post_ra>
// kernel: tpu_custom_call.1
= control target key start
LH: loop header
LB: loop body
LE: loop exit
PB: predicated region body
PF: predicated region fallthrough
CT: control target
= control target key end

     0   :  { %7 = vsyncpa [#allocation5], 0  ;;  %s2250_s0 = inlined_call_operand.hbm [shape: f32[2,4], index: 0, kind: input, shape index: {}]   ;;  %s2251_s1 = inlined_call_operand.hbm [shape: f32[2,1,16,16], index: 1, kind: input, shape index: {}]   ;;  %s2252_s2 = inlined_call_operand.hbm [shape: f32[2,1,32,32], index: 2, kind: output, shape index: {}]  }
   0x1   :  { %8 = vsyncpa [#allocation3], 0 }
   0x2   :  { %10 = vsyncpa [#allocation3 + $0x1], 0 }
   0x3   :  { %11 = vsyncpa [#allocation4], 0 }
   0x4   :  { %13 = vsyncpa [#allocation4 + $0x1], 0  ;;  %s1983_s9 = smov 0   ;;  %s1985_s10 = smov 0  }
   0x5   :  { %s1987_s11 = smov 0   ;;  %s1989_s12 = smov 0  }
   0x6 LB: > { %s2004_s13 = sadd.s32 4294967295, %s1959_s12   ;;  %s1514_s14 = sadd.s32 4294967294, %s1959_s12   ;;  %s1959_s12 = sphi %s1989_s12, %s2272_s12   ;;  %s1955_s11 = sphi %s1987_s11, %s2271_s11   ;;  %s1951_s10 = sphi %s1985_s10, %s2270_s10   ;;  %s1947_s9 = sphi %s1983_s9, %s2269_s9  }
   0x7   : > { %s2008_s15 = sadd.s32 1, %s1959_s12   ;;  %s47_s16 = sadd.s32 1, %s1955_s11 }
   0x8   : > { %s44_s17 = ssub.s32 %s1959_s12, %s2008_s15  ;;  %p54_p0 = scmp.ne.s32.totalorder %s1955_s11, %s1951_s10 }
   0x9   : > { %p45_p1 = scmp.eq.s32.totalorder %s44_s17, 0  ;;  %p55_p2 = scmp.eq.s32.totalorder %s1959_s12, 0 }
   0xa   : > { %p60_p3 = scmp.ne.s32.totalorder %s1951_s10, %s1947_s9  ;;  %p2253_p4 = scmp.eq.s32.totalorder %s2004_s13, 0 }
   0xb   : > { %s2020_s18 = scalar_select %p45_p1, %s1955_s11, %s47_s16  }
   0xc   : > { %p2022_p5 = por %p55_p2, %p54_p0  ;;  %p2028_p6 = por %p2253_p4, %p60_p3 }
   0xd   : > { %p84_p7 = scmp.eq.s32.totalorder %s2004_s13, 1  ;;  %p90_p8 = scmp.eq.s32.totalorder %s1514_s14, 1 }
   0xe   : > { %s2257_s20 = scalar_select %p2028_p6, 1, 0 }
   0xf   : > { %p1515_p9 = scmp.ge.s32.totalorder %s1959_s12, 1  ;;  %p97_p10 = scmp.lt.s32.totalorder %s1959_s12, 3 }
  0x10   : > { %p2035_p11 = por %p84_p7, %p54_p0  ;;  %p2039_p12 = por %p90_p8, %p60_p3 }
  0x11   : > { %p2043_p13 = pnand %p1515_p9, %p97_p10  ;;  %p1806_p4 = scmp.lt.s32.totalorder %s1959_s12, 2 }
  0x12   : > { %s2258_s21 = scalar_select %p2035_p11, 1, 0 }
  0x13   : > { %s2259_s22 = scalar_select %p2039_p12, 1, 0 }
  0x14   : > { %p1793_p2 = pneg %p2043_p13  ;;  %s119_s24 = sand.u32 1, %s1955_s11  }
  0x15   : > { %s1541_s25 = sshll.u32 %s1959_s12, 8  ;;  %p2261_p6 = scmp.eq.s32.totalorder %s2004_s13, 0 }
  0x16   : > { %p2057_p7 = pnand %p1806_p4, %p2022_p5  ;;  %s1518_s27 = sshll.u32 %s119_s24, 4 }
  0x17   : > { %p1794_p0 = pnand %p1793_p2, %p2261_p6  ;;  %s1846_s30 = scalar_lea.hbm %s2250_s0, 32 }
  0x18   : > { %p1847_p3 = scmp.ne.s32.totalorder %s2250_s0, %s1846_s30  ;;  %p1853_p6 = scmp.lt.u32.totalorder %s1846_s30, %s2250_s0 }
  0x19   : > { %p1848_p8 = pneg %p1794_p0 }
  0x1b   : > { %p1849_p9 = pnand %p1848_p8, %p1847_p3 }
  0x1d   : > { %p1850_p10 = pneg %p1849_p9 }
  0x1f   : > { %p1855_p4 = pnand %p1853_p6, %p1850_p10 }
  0x21   : > { %1858 = shalt.err (!%p1855_p4)
}
  0x22   : > { %s1961_s7 = smov [#allocation2]   ;;  %s2076_s19 = scalar_lea.hbm %s2251_s1, %s1541_s25 }
  0x23   : > { %1796 = dma.hbm_to_smem (!%p1794_p0), %s2250_s0, 32, %s1961_s7, [#allocation5]  }
  0x24   : > { %s123_s28 = scalar_lea.vmem [#allocation6], %s1518_s27  ;;  %s2080_s30 = scalar_lea.sflag [#allocation3], %s119_s24 }
  0x25   : > { %s130_s29 = sshll.u32 %s123_s28, 4  ;;  %s1859_s3 = scalar_lea.hbm %s2076_s19, 256  ;;  %s2078_s29 = int_to_ptr.vmem [resolvable:$true] %s130_s29 }
  0x26   : > { %p1860_p5 = scmp.ne.s32.totalorder %s2076_s19, %s1859_s3  ;;  %p1861_p2 = pneg %p2057_p7 }
  0x27   : > { %s1864_s5 = scalar_lea.hbm %s2251_s1, 512  ;;  %p1865_p8 = scmp.lt.u32.totalorder %s2076_s19, %s2251_s1 }
  0x28   : > { %p1862_p0 = pnand %p1861_p2, %p1860_p5  ;;  %p1866_p9 = scmp.lt.u32.totalorder %s1864_s5, %s1859_s3 }
  0x29   : > { %p1868_p6 = scmp.lt.u32.totalorder %s1859_s3, %s2076_s19 }
  0x2a   : > { %p1863_p3 = pneg %p1862_p0  ;;  %p1867_p10 = por %p1866_p9, %p1865_p8 }
  0x2c   : > { %p1869_p4 = por %p1868_p6, %p1867_p10 }
  0x2e   : > { %p1870_p1 = pnand %p1869_p4, %p1863_p3 }
  0x30   : > { %1873 = shalt.err (!%p1870_p1)
}
  0x31   : > { %s1874_s24 = scalar_lea.vmem %s2078_s29, 256  ;;  %s1962_s27 = smov [#allocation6]  }
  0x32   : > { %p1875_p5 = scmp.ne.s32.totalorder %s2078_s29, %s1874_s24  ;;  %s1879_s8 = sshll.u32 %s1962_s27, 4  ;;  %s1880_s8 = int_to_ptr.vmem [resolvable:$false] %s1879_s8 }
  0x33   : > { %s1881_s14 = scalar_lea.vmem %s1880_s8, 512  ;;  %p1882_p11 = scmp.lt.s32.totalorder %s2078_s29, %s1880_s8 }
  0x34   : > { %p1877_p0 = pnand %p1875_p5, %p1861_p2  ;;  %p1883_p8 = scmp.lt.s32.totalorder %s1881_s14, %s1874_s24 }
  0x36   : > { %p1878_p12 = pneg %p1877_p0  ;;  %p1884_p9 = por %p1883_p8, %p1882_p11 }
  0x38   : > { %p1885_p10 = pnand %p1884_p9, %p1878_p12 }
  0x3a   : > { %1888 = shalt.err (!%p1885_p10)
}
  0x3b   : > { %s1963_s16 = smov 128   ;;  %s1964_s17 = smov 8  }
  0x3c   : > { %1800 = dma.hbm_to_vmem [thread:$0]  (!%p2057_p7), %s2076_s19, 256, %s2078_s29, %s2080_s30, %s1963_s16, %s1963_s16, %s1964_s17  }
  0x3d   : > { %142 = sbr.rel (%p2043_p13) target bundleno = 649 (0x289), region = 28  ;;  %p2263_p1 = scmp.eq.s32.totalorder (!%p2043_p13), %s2004_s13, 0 }
  0x44   : > { %1934 = dma.done.wait (%p2263_p1), [#allocation5], 32   ;;  %p2264_p2 = pmov %p2263_p1 }
  0x45   : > { %s2115_s28 = sand.u32 1, %s1951_s10   ;;  %p2265_p11 = scmp.ne.s32.totalorder %s2257_s20, 0 }
  0x46   : > { %1936 = vsyncadd (%p2264_p2), [#allocation5], 4294967264  ;;  %s1523_s3 = sshll.u32 %s2115_s28, 4  ;;  %s149_s25 = scalar_lea.sflag [#allocation3], %s2115_s28 }
  0x47   : > { %s152_s4 = scalar_lea.vmem [#allocation6], %s1523_s3 }
  0x48   : > { %1938 = dma.done.wait (%p2265_p11), %s149_s25, 256  }
  0x49   : > { %1940 = vsyncadd (%p2265_p11), %s149_s25, 4294967040 }
  0x4a   : > { %157 = sfence }
  0x4b   : > { %s2124_s23 = sshll.u32 %s2004_s13, 7  ;;  %v182_v0 = vlaneseq  ;;  %v299_v1 = vld [vmem:[%s152_s4] sm:$0xff]  ;;  %vm301_vm0 = vcmask 130048   ;;  %v300_v19 = vld [vmem:[%s152_s4 + $0x8] sm:$0xff]  ;;  %s1524_s7 = sshll.u32 %s2115_s28, 5  ;;  %vm1410_vm13 = vcmask 261120  }
  0x4c   : > { %v303_v2 = vsel %vm301_vm0, %v299_v1, 0  ;;  %s178_s26 = sadd.s32 2, %s2124_s23  ;;  %s175_s19 = sld [smem:[#allocation2 + %s2124_s23]]  ;;  %v306_v22 = vsel %vm301_vm0, %v300_v19, 0 }
  0x4d   : > { %v183_v3 = vand.u32 127, %v182_v0  ;;  %v2128_v4 = vand.u32 4294901760, %v303_v2  ;;  %s179_s20 = sld [smem:[#allocation2 + %s178_s26]]  ;;  %v2141_v18 = vshrl.u32 %v182_v0, 7  ;;  %v385_v25 = vand.u32 4294901760, %v306_v22  ;;  %s176_s29 = sadd.s32 1, %s2124_s23 }
  0x4e   : > { %s177_s30 = sld [smem:[#allocation2 + %s176_s29]]  ;;  %s180_s5 = sadd.s32 3, %s2124_s23 }
  0x4f   : > { %v2131_v5 = vcvt.s32.f32 %v183_v3  ;;  %v2134_v6 = vsub.f32 %v303_v2, %v2128_v4  ;;  %v187_v23 = vadd.s32 8, %v2141_v18  ;;  %v190_v27 = vcvt.s32.f32 %v2141_v18  ;;  %s181_s6 = sld [smem:[#allocation2 + %s180_s5]]  ;;  %s173_s24 = scalar_lea.vmem [#allocation7], %s1524_s7 }
  0x50   : > { %v386_v30 = vsub.f32 %v306_v22, %v385_v25  ;;  %v188_v2 = vadd.s32 16, %v2141_v18  ;;  %s1429_s27 = sshll.u32 %s173_s24, 4  ;;  %s1542_s8 = sshll.u32 %s2004_s13, 9  ;;  %s2198_s27 = int_to_ptr.vmem [resolvable:$true] %s1429_s27 }
  0x51   : > { %v194_v7 = vmul.f32 2.0, %v2131_v5  ;;  %v377_v8 = vand.u32 4294901760, %v2134_v6  ;;  %v191_v28 = vcvt.s32.f32 %v187_v23  ;;  %v199_v57 = vmul.f32 2.0, %v190_v27  ;;  %s2204_s17 = scalar_lea.hbm %s2252_s2, %s1542_s8  ;;  %s1416_s13 = scalar_lea.sflag [#allocation4], %s2115_s28 }
  0x52   : > { %v215_v13 = vstv %s175_s19  ;;  %v387_v36 = vand.u32 4294901760, %v386_v30  ;;  %s1889_s3 = scalar_lea.vmem %s2198_s27, 512  ;;  %p2266_p13 = scmp.ne.s32.totalorder %s2258_s21, 0 }
  0x53   : > { %v195_v9 = vadd.f32 1.0, %v194_v7  ;;  %v378_v10 = vsub.f32 %v2134_v6, %v377_v8  ;;  %v217_v15 = vstv %s179_s20  ;;  %v200_v58 = vmul.f32 2.0, %v191_v28  ;;  %p1890_p12 = scmp.ne.s32.totalorder %s2198_s27, %s1889_s3  ;;  %s1965_s25 = smov [#allocation7]  }
  0x54   : > { %v388_v43 = vsub.f32 %v386_v30, %v387_v36  ;;  %v203_v59 = vadd.f32 1.0, %v199_v57  ;;  %v219_v0 = vstv %s177_s30  ;;  %s1893_s4 = sshll.u32 %s1965_s25, 4  ;;  %s1894_s4 = int_to_ptr.vmem [resolvable:$false] %s1893_s4 }
  0x55   : > { %v197_v11 = vmul.f32 0.03125, %v195_v9  ;;  %v379_v12 = vand.u32 4294901760, %v378_v10  ;;  %v204_v60 = vadd.f32 1.0, %v200_v58  ;;  %p1891_p7 = pnand %p1890_p12, %p2266_p13  ;;  %s1895_s23 = scalar_lea.vmem %s1894_s4, 1024 }
  0x56   : > { %v389_v47 = vand.u32 4294901760, %v388_v43  ;;  %v207_v61 = vmul.f32 0.03125, %v203_v59  ;;  %p1896_p6 = scmp.lt.s32.totalorder %s2198_s27, %s1894_s4  ;;  %p1897_p4 = scmp.lt.s32.totalorder %s1895_s23, %s1889_s3 }
  0x57   : > { %v1526_v14 = vadd.f32 -1.0, %v197_v11  ;;  %1607 = vmatprep.mubr.f32.mxu0 %v379_v12  ;;  %v208_v62 = vmul.f32 0.03125, %v204_v60  ;;  %p1892_p3 = pneg %p1891_p7 }
  0x58   : > { %v1527_v63 = vadd.f32 -1.0, %v207_v61  ;;  %p1898_p5 = por %p1897_p4, %p1896_p6 }
  0x59   : > { %v216_v16 = vmul.f32 %v1526_v14, %v215_v13  ;;  %v1528_v1 = vadd.f32 -1.0, %v208_v62 }
  0x5a   : > { %v220_v3 = vmul.f32 %v1527_v63, %v219_v0  ;;  %p1899_p0 = pnand %p1898_p5, %p1892_p3 }
  0x5b   : > { %v218_v17 = vadd.f32 %v217_v15, %v216_v16  ;;  %v221_v7 = vmul.f32 %v1528_v1, %v219_v0 }
  0x5d   : > { %v229_v20 = vadd.f32 1.0, %v218_v17 }
  0x5f   : > { %v230_v21 = vmul.f32 16.0, %v229_v20 }
  0x61   : > { %v1531_v24 = vadd.f32 -1.0, %v230_v21 }
  0x63   : > { %v232_v26 = vmul.f32 0.5, %v1531_v24 }
  0x65   : > { %v285_v29 = vfloor.f32 %v232_v26 }
  0x67   : > { %v286_v31 = vsub.f32 %v232_v26, %v285_v29  ;;  %v292_v32 = vadd.f32 1.0, %v285_v29  ;;  %vm288_vm1 = vcmp.eq.f32.partialorder %v190_v27, %v285_v29  ;;  %vm289_vm2 = vcmp.eq.f32.partialorder %v191_v28, %v285_v29 }
  0x69   : > { %v287_v33 = vsub.f32 1.0, %v286_v31  ;;  %vm293_vm3 = vcmp.eq.f32.partialorder %v190_v27, %v292_v32  ;;  %vm294_vm4 = vcmp.eq.f32.partialorder %v191_v28, %v292_v32 }
  0x6a   : > { %v295_v34 = vsel %vm293_vm3, %v286_v31, 0.0  ;;  %v296_v35 = vsel %vm294_vm4, %v286_v31, 0.0 }
  0x6b   : > { %v290_v37 = vsel %vm288_vm1, %v287_v33, 0.0  ;;  %v291_v38 = vsel %vm289_vm2, %v287_v33, 0.0 }
  0x6c   : > { %v297_v39 = vadd.f32 %v295_v34, %v290_v37  ;;  %v298_v40 = vadd.f32 %v296_v35, %v291_v38 }
  0x6e   : > { %v309_v41 = vand.u32 4294901760, %v297_v39  ;;  %v312_v42 = vand.u32 4294901760, %v298_v40 }
  0x70   : > { %v1705_v44 = vpack.c.bf16 %v312_v42, %v309_v41  ;;  %v397_v45 = vsub.f32 %v297_v39, %v309_v41  ;;  %v404_v46 = vsub.f32 %v298_v40, %v312_v42 }
  0x72   : > { %1706 = vmatprep.subr.bf16.mxu0 %v1705_v44  ;;  %v398_v48 = vand.u32 4294901760, %v397_v45  ;;  %v405_v49 = vand.u32 4294901760, %v404_v46  ;;  %v1713_v55 = vpack.c.bf16 %v404_v46, %v397_v45 }
  0x73   : > { %1708 = vmatpush3.bf16.msra.mxu0 %v1705_v44 }
  0x74   : > { %v399_v50 = vsub.f32 %v397_v45, %v398_v48  ;;  %v406_v51 = vsub.f32 %v404_v46, %v405_v49  ;;  %v1721_v56 = vpack.c.bf16 %v405_v49, %v398_v48 }
  0x76   : > { %1608 = vmatmul.mubr.f32.vlgmr.msra.gmra.mrb[0].mxu0 %v389_v47  ;;  %v400_v52 = vand.u32 4294901760, %v399_v50  ;;  %v407_v53 = vand.u32 4294901760, %v406_v51 }
  0x77   : > { %1614 = vmatprep.mubr.f32.mxu0 %v2128_v4 }
  0x78   : > { %v1709_v54 = vpack.c.bf16 %v407_v53, %v400_v52 }
  0x7a   : > { %1710 = vmatprep.subr.bf16.mxu0 %v1709_v54 }
  0x7b   : > { %1712 = vmatpush3.bf16.msra.mxu0 %v1709_v54 }
  0x7c   : > { %1714 = vmatprep.subr.bf16.mxu0 %v1713_v55 }
  0x7e   : > { %1615 = vmatmul.mubr.f32.vlgmr.msra.gmra.mrb[0].mxu0 %v385_v25 }
  0x7f   : > { %1716 = vmatpush3.bf16.msra.mxu0 %v1713_v55  ;;  %1621 = vmatprep.mubr.f32.mxu0 %v2134_v6  ;;  %v189_v6 = vadd.s32 24, %v2141_v18 }
  0x80   : > { %1718 = vmatprep.subr.bf16.mxu0 %v1705_v44 }
  0x81   : > { %v193_v10 = vcvt.s32.f32 %v189_v6 }
  0x83   : > { %v202_v14 = vmul.f32 2.0, %v193_v10 }
  0x85   : > { %v206_v17 = vadd.f32 1.0, %v202_v14 }
  0x86   : > { %1622 = vmatmul.mubr.f32.vlgmr.msra.gmra.mrb[0].mxu0 %v386_v30 }
  0x87   : > { %1720 = vmatpush3.bf16.msra.mxu0 %v1705_v44  ;;  %1628 = vmatprep.mubr.f32.mxu0 %v377_v8  ;;  %v192_v8 = vcvt.s32.f32 %v188_v2  ;;  %v210_v21 = vmul.f32 0.03125, %v206_v17 }
  0x88   : > { %1722 = vmatprep.subr.bf16.mxu0 %v1721_v56 }
  0x89   : > { %v201_v12 = vmul.f32 2.0, %v192_v8  ;;  %v1530_v24 = vadd.f32 -1.0, %v210_v21 }
  0x8b   : > { %v205_v15 = vadd.f32 1.0, %v201_v12  ;;  %v223_v26 = vmul.f32 %v1530_v24, %v219_v0 }
  0x8d   : > { %v209_v19 = vmul.f32 0.03125, %v205_v15 }
  0x8e   : > { %1629 = vmatmul.mubr.f32.vlgmr.msra.gmra.mrb[0].mxu0 %v387_v36 }
  0x8f   : > { %1724 = vmatpush3.bf16.msra.mxu0 %v1721_v56  ;;  %1635 = vmatprep.mubr.f32.mxu0 %v2128_v4  ;;  %v1529_v22 = vadd.f32 -1.0, %v209_v19 }
  0x90   : > { %1726 = vmatprep.subr.bf16.mxu0 %v1705_v44 }
  0x96   : > { %1636 = vmatmul.mubr.f32.vlgmr.msra.gmra.mrb[0].mxu0 %v385_v25 }
  0x97   : > { %1728 = vmatpush3.bf16.msra.mxu0 %v1705_v44  ;;  %1642 = vmatprep.mubr.f32.mxu0 %v2128_v4  ;;  %v224_v4 = vstv %s181_s6 }
  0x98   : > { %v225_v9 = vadd.f32 %v224_v4, %v220_v3  ;;  %v226_v11 = vadd.f32 %v224_v4, %v221_v7  ;;  %v228_v29 = vadd.f32 %v224_v4, %v223_v26 }
  0x9a   : > { %v233_v13 = vadd.f32 1.0, %v225_v9  ;;  %v234_v54 = vadd.f32 1.0, %v226_v11  ;;  %v236_v57 = vadd.f32 1.0, %v228_v29 }
  0x9c   : > { %v237_v16 = vmul.f32 16.0, %v233_v13  ;;  %v238_v55 = vmul.f32 16.0, %v234_v54  ;;  %v240_v59 = vmul.f32 16.0, %v236_v57 }
  0x9e   : > { %1643 = vmatmul.mubr.f32.vlgmr.msra.gmra.mrb[0].mxu0 %v385_v25  ;;  %v1532_v20 = vadd.f32 -1.0, %v237_v16  ;;  %v222_v25 = vmul.f32 %v1529_v22, %v219_v0  ;;  %v1533_v56 = vadd.f32 -1.0, %v238_v55  ;;  %v1535_v61 = vadd.f32 -1.0, %v240_v59 }
  0xa0   : > { %v245_v23 = vmul.f32 0.5, %v1532_v20  ;;  %v227_v27 = vadd.f32 %v224_v4, %v222_v25  ;;  %v246_v58 = vmul.f32 0.5, %v1533_v56  ;;  %v248_v0 = vmul.f32 0.5, %v1535_v61 }
  0xa2   : > { %v249_v18 = vfloor.f32 %v245_v23  ;;  %v235_v31 = vadd.f32 1.0, %v227_v27  ;;  %v250_v60 = vfloor.f32 %v246_v58  ;;  %v252_v2 = vfloor.f32 %v248_v0 }
  0xa4   : > { %v253_v28 = vsub.f32 %v245_v23, %v249_v18  ;;  %v269_v30 = vadd.f32 1.0, %v249_v18  ;;  %vm261_vm5 = vcmp.eq.f32.partialorder %v2131_v5, %v249_v18  ;;  %v239_v33 = vmul.f32 16.0, %v235_v31 }
  0xa5   : > { %v254_v62 = vsub.f32 %v246_v58, %v250_v60  ;;  %v270_v63 = vadd.f32 1.0, %v250_v60  ;;  %vm262_vm9 = vcmp.eq.f32.partialorder %v2131_v5, %v250_v60  ;;  %v256_v4 = vsub.f32 %v248_v0, %v252_v2 }
  0xa6   : > { %v257_v32 = vsub.f32 1.0, %v253_v28  ;;  %vm273_vm6 = vcmp.eq.f32.partialorder %v2131_v5, %v269_v30  ;;  %v1534_v37 = vadd.f32 -1.0, %v239_v33  ;;  %v272_v8 = vadd.f32 1.0, %v252_v2 }
  0xa7   : > { %v277_v35 = vsel %vm273_vm6, %v253_v28, 0.0  ;;  %v258_v1 = vsub.f32 1.0, %v254_v62  ;;  %vm274_vm10 = vcmp.eq.f32.partialorder %v2131_v5, %v270_v63  ;;  %v260_v9 = vsub.f32 1.0, %v256_v4 }
  0xa8   : > { %v265_v34 = vsel %vm261_vm5, %v257_v32, 0.0  ;;  %v247_v39 = vmul.f32 0.5, %v1534_v37  ;;  %v278_v6 = vsel %vm274_vm10, %v254_v62, 0.0  ;;  %vm264_vm11 = vcmp.eq.f32.partialorder %v2131_v5, %v252_v2 }
  0xa9   : > { %v281_v36 = vadd.f32 %v277_v35, %v265_v34  ;;  %v266_v3 = vsel %vm262_vm9, %v258_v1, 0.0  ;;  %vm276_vm12 = vcmp.eq.f32.partialorder %v2131_v5, %v272_v8  ;;  %v268_v12 = vsel %vm264_vm11, %v260_v9, 0.0 }
  0xaa   : > { %v251_v41 = vfloor.f32 %v247_v39  ;;  %v282_v7 = vadd.f32 %v278_v6, %v266_v3  ;;  %v280_v13 = vsel %vm276_vm12, %v256_v4, 0.0 }
  0xab   : > { %v811_v38 = vsel %vm301_vm0, %v281_v36, 0  ;;  %v284_v14 = vadd.f32 %v280_v13, %v268_v12 }
  0xac   : > { %v2159_v40 = vand.u32 4294901760, %v811_v38  ;;  %v255_v43 = vsub.f32 %v247_v39, %v251_v41  ;;  %v271_v45 = vadd.f32 1.0, %v251_v41  ;;  %vm263_vm7 = vcmp.eq.f32.partialorder %v2131_v5, %v251_v41 }
  0xad   : > { %v814_v10 = vsel %vm301_vm0, %v282_v7, 0  ;;  %v820_v16 = vsel %vm301_vm0, %v284_v14, 0 }
  0xae   : > { %v2162_v42 = vsub.f32 %v811_v38, %v2159_v40  ;;  %v259_v46 = vsub.f32 1.0, %v255_v43  ;;  %vm275_vm8 = vcmp.eq.f32.partialorder %v2131_v5, %v271_v45  ;;  %v2179_v11 = vand.u32 4294901760, %v814_v10 }
  0xaf   : > { %v279_v49 = vsel %vm275_vm8, %v255_v43, 0.0  ;;  %v919_v22 = vand.u32 4294901760, %v820_v16 }
  0xb0   : > { %v891_v44 = vand.u32 4294901760, %v2162_v42  ;;  %v267_v48 = vsel %vm263_vm7, %v259_v46, 0.0  ;;  %v900_v15 = vsub.f32 %v814_v10, %v2179_v11 }
  0xb1   : > { %v283_v51 = vadd.f32 %v279_v49, %v267_v48  ;;  %v920_v5 = vsub.f32 %v820_v16, %v919_v22 }
  0xb2   : > { %v892_v47 = vsub.f32 %v2162_v42, %v891_v44  ;;  %v901_v19 = vand.u32 4294901760, %v900_v15 }
  0xb3   : > { %v817_v52 = vsel %vm301_vm0, %v283_v51, 0  ;;  %v921_v30 = vand.u32 4294901760, %v920_v5 }
  0xb4   : > { %v893_v50 = vand.u32 4294901760, %v892_v47  ;;  %v2171_v53 = vand.u32 4294901760, %v817_v52  ;;  %v902_v18 = vsub.f32 %v900_v15, %v901_v19 }
  0xb5   : > { %v922_v39 = vsub.f32 %v920_v5, %v921_v30 }
  0xb6   : > { %1649 = vmatprep.mubr.f32.mxu0 %v893_v50  ;;  %1662 = vmatprep.mubr.f32.mxu1 %v2171_v53  ;;  %v910_v17 = vsub.f32 %v817_v52, %v2171_v53  ;;  %v903_v33 = vand.u32 4294901760, %v902_v18 }
  0xb7   : > { %v923_v46 = vand.u32 4294901760, %v922_v39 }
  0xb8   : > { %v911_v20 = vand.u32 4294901760, %v910_v17 }
  0xba   : > { %v912_v27 = vsub.f32 %v910_v17, %v911_v20 }
  0xbc   : > { %v913_v36 = vand.u32 4294901760, %v912_v27 }
 0x171   : > { %v1644_v21 = vpop.f32.mrb[0].mxu0 }
 0x172   : > { %v826_v23 = vand.u32 4294901760, %v1644_v21  ;;  %v800_v24 = vpop.f32.mrb[1].mxu0 }
 0x173   : > { %v823_v25 = vand.u32 4294901760, %v800_v24 }
 0x174   : > { %v938_v26 = vsub.f32 %v1644_v21, %v826_v23 }
 0x175   : > { %v1729_v28 = vpack.c.bf16 %v826_v23, %v823_v25  ;;  %v931_v29 = vsub.f32 %v800_v24, %v823_v25 }
 0x176   : > { %v939_v31 = vand.u32 4294901760, %v938_v26 }
 0x177   : > { %v932_v32 = vand.u32 4294901760, %v931_v29  ;;  %1730 = vmatprep.subr.bf16.mxu0 %v1729_v28  ;;  %v1737_v34 = vpack.c.bf16 %v938_v26, %v931_v29 }
 0x178   : > { %v940_v35 = vsub.f32 %v938_v26, %v939_v31  ;;  %1732 = vmatpush3.bf16.msra.mxu0 %v1729_v28 }
 0x179   : > { %v933_v37 = vsub.f32 %v931_v29, %v932_v32  ;;  %v1745_v38 = vpack.c.bf16 %v939_v31, %v932_v32 }
 0x17a   : > { %v941_v41 = vand.u32 4294901760, %v940_v35 }
 0x17b   : > { %v934_v43 = vand.u32 4294901760, %v933_v37  ;;  %1650 = vmatmul.mubr.f32.vlgmr.msra.gmra.mrb[2].mxu0 %v903_v33 }
 0x17c   : > { %1652 = vmatprep.mubr.f32.mxu0 %v913_v36 }
 0x17d   : > { %v1733_v45 = vpack.c.bf16 %v941_v41, %v934_v43 }
 0x17f   : > { %1734 = vmatprep.subr.bf16.mxu0 %v1733_v45  ;;  %1753 = vmatprep.subr.bf16.mxu1 %v1733_v45 }
 0x180   : > { %1736 = vmatpush3.bf16.msra.mxu0 %v1733_v45  ;;  %1754 = vmatpush3.bf16.msra.mxu1 %v1733_v45 }
 0x181   : > { %1738 = vmatprep.subr.bf16.mxu1 %v1737_v34  ;;  %1653 = vmatmul.mubr.f32.gmra.mrb[4].mxu0 %v923_v46 }
 0x182   : > { %1659 = vmatprep.mubr.f32.mxu0 %v2159_v40 }
 0x183   : > { %1663 = vmatmul.mubr.f32.vlgmr.msra.gmra.mrb[0].mxu1 %v919_v22 }
 0x184   : > { %1740 = vmatpush3.bf16.msra.mxu1 %v1737_v34  ;;  %1669 = vmatprep.mubr.f32.mxu1 %v2162_v42 }
 0x185   : > { %1742 = vmatprep.subr.bf16.mxu1 %v1729_v28  ;;  %1660 = vmatmul.mubr.f32.vlgmr.msra.gmra.mrb[2].mxu0 %v2179_v11 }
 0x187   : > { %1670 = vmatmul.mubr.f32.vlgmr.msra.gmra.mrb[2].mxu1 %v900_v15 }
 0x188   : > { %1744 = vmatpush3.bf16.msra.mxu1 %v1729_v28  ;;  %1672 = vmatprep.mubr.f32.mxu1 %v910_v17 }
 0x189   : > { %1746 = vmatprep.subr.bf16.mxu1 %v1745_v38 }
 0x18b   : > { %1673 = vmatmul.mubr.f32.gmra.mrb[0].mxu1 %v920_v5 }
 0x18c   : > { %1679 = vmatprep.mubr.f32.mxu1 %v891_v44 }
 0x18f   : > { %1680 = vmatmul.mubr.f32.vlgmr.msra.gmra.mrb[2].mxu1 %v901_v19 }
 0x190   : > { %1748 = vmatpush3.bf16.msra.mxu1 %v1745_v38  ;;  %1682 = vmatprep.mubr.f32.mxu1 %v911_v20 }
 0x191   : > { %1750 = vmatprep.subr.bf16.mxu1 %v1729_v28 }
 0x193   : > { %1683 = vmatmul.mubr.f32.gmra.mrb[0].mxu1 %v921_v30 }
 0x194   : > { %1689 = vmatprep.mubr.f32.mxu1 %v2159_v40 }
 0x197   : > { %1690 = vmatmul.mubr.f32.vlgmr.msra.gmra.mrb[2].mxu1 %v2179_v11 }
 0x198   : > { %1752 = vmatpush3.bf16.msra.mxu1 %v1729_v28  ;;  %1692 = vmatprep.mubr.f32.mxu1 %v2171_v53 }
 0x19b   : > { %1693 = vmatmul.mubr.f32.gmra.mrb[0].mxu1 %v919_v22 }
 0x19c   : > { %1699 = vmatprep.mubr.f32.mxu1 %v2159_v40 }
 0x19f   : > { %1700 = vmatmul.mubr.f32.vlgmr.msra.gmra.mrb[2].mxu1 %v2179_v11 }
 0x1a0   : > { %1702 = vmatprep.mubr.f32.mxu1 %v2171_v53 }
 0x1a3   : > { %1703 = vmatmul.mubr.f32.gmra.mrb[0].mxu1 %v919_v22 }
 0x254   : > { %v1654_v42 = vpop.f32.mrb[4].mxu0 }
 0x255   : > { %v915_v44 = vpop.f32.mrb[5].mxu0 }
 0x258   : > { %v1661_v47 = vpop.f32.mrb[2].mxu0 }
 0x259   : > { %v1006_v48 = vpop.f32.mrb[3].mxu0 }
 0x272   : > { %v1701_v49 = vpop.f32.mrb[2].mxu1 }
 0x273   : > { %v1755_v50 = vadd.f32 %v1701_v49, %v1661_v47  ;;  %v1388_v51 = vpop.f32.mrb[3].mxu1 }
 0x274   : > { %v1756_v40 = vadd.f32 %v1388_v51, %v1006_v48 }
 0x275   : > { %1412 = vst.msk [vmem:[%s173_s24 + $0x8] sm:$0xff] %vm1410_vm13, %v1755_v50 }
 0x276   : > { %1411 = vst.msk [vmem:[%s173_s24] sm:$0xff] %vm1410_vm13, %v1756_v40  ;;  %v1704_v52 = vpop.f32.mrb[0].mxu1 }
 0x277   : > { %v1757_v53 = vadd.f32 %v1704_v52, %v1654_v42  ;;  %v1400_v54 = vpop.f32.mrb[1].mxu1 }
 0x278   : > { %v1758_v55 = vadd.f32 %v1400_v54, %v915_v44 }
 0x279   : > { %1414 = vst.msk [vmem:[%s173_s24 + $0x18] sm:$0xff] %vm1410_vm13, %v1757_v53 }
 0x27a   : > { %1413 = vst.msk [vmem:[%s173_s24 + $0x10] sm:$0xff] %vm1410_vm13, %v1758_v55 }
 0x27b   : > { %1902 = shalt.err (!%p1899_p0)
}
 0x27c   : > { %s1903_s26 = scalar_lea.hbm %s2204_s17, 512  ;;  %s1907_s29 = scalar_lea.hbm %s2252_s2, 1024 }
 0x27d   : > { %p1904_p8 = scmp.ne.s32.totalorder %s2204_s17, %s1903_s26  ;;  %p1908_p1 = scmp.lt.u32.totalorder %s2204_s17, %s2252_s2 }
 0x27e   : > { %p1909_p2 = scmp.lt.u32.totalorder %s1907_s29, %s1903_s26  ;;  %p1911_p12 = scmp.lt.u32.totalorder %s1903_s26, %s2204_s17 }
 0x27f   : > { %p1905_p9 = pnand %p1904_p8, %p2266_p13 }
 0x280   : > { %p1910_p11 = por %p1909_p2, %p1908_p1 }
 0x281   : > { %p1906_p10 = pneg %p1905_p9 }
 0x282   : > { %p1912_p7 = por %p1911_p12, %p1910_p11 }
 0x284   : > { %p1913_p3 = pnand %p1912_p7, %p1906_p10 }
 0x286   : > { %1916 = shalt.err (!%p1913_p3)
}
 0x287   : > { %s1966_s6 = smov 128   ;;  %s1967_s7 = smov 8  }
 0x288   : > { %1791 = dma.vmem_to_hbm [thread:$0]  (%p2266_p13), %s2198_s27, 512, %s2204_s17, %s1416_s13, %s1966_s6, %s1966_s6, %s1967_s7  }
 0x289 PF: > { %s1444_s24 = sand.u32 1, %s1947_s9   ;;  %p2267_p6 = scmp.ne.s32.totalorder %s2259_s22, 0 }
 0x28a   : > { %p2268_p4 = scmp.ge.s32.totalorder %s1959_s12, 2  ;;  %s1445_s8 = scalar_lea.sflag [#allocation4], %s1444_s24 }
 0x28c   : > { %p1802_p5 = pnand %p2268_p4, %p2267_p6 }
 0x28e   : > { %1942 = dma.done.wait (!%p1802_p5), %s1445_s8, 512  }
 0x28f   : > { %1944 = vsyncadd (!%p1802_p5), %s1445_s8, 4294966784  ;;  %p16_p0 = scmp.ge.s32.totalorder %s2008_s15, 4   ;;  %s2269_s9 = smov %s1951_s10 }
 0x290   : > { %s2270_s10 = smov %s1955_s11  ;;  %s2271_s11 = smov %s2020_s18 }
 0x291   : > { %s2272_s12 = smov %s2008_s15  ;;  %18 = sbr.rel (!%p16_p0) target bundleno = 6 (0x6), region = 78 }
 0x298   :  { %1450 = vsyncpa [#allocation3], 1 }
 0x299   :  { %1452 = vsyncpa [#allocation3 + $0x1], 1 }
 0x29a   :  { %1453 = vsyncpa [#allocation4], 1 }
 0x29b   :  { %1455 = vsyncpa [#allocation4 + $0x1], 1 }
 0x29c   :  { %1456 = vsyncpa [#allocation5], 1 }
 0x29d   :  { %1458 = vsyncpa [#allocation5 + $0x1], 1 }

</bundles_post_ra>
